<compile_context>
chip_gen: v5e
topology: v5e:2x2
jax: 0.10.0
libtpu: 0.0.40
codegen_flags: <defaults>
</compile_context>

<pallas_src>
import functools

import jax
import jax.numpy as jnp
from jax.experimental import pallas as pl
from jax.experimental.pallas import tpu as pltpu


def _round_up(x, m):
    return (x + m - 1) // m * m


_MAX_SINGLE_K = 2048          # largest reduction handled as a single MXU block


def _tpu_defaults():
    """Generation-aware knobs (v5e vs v6e/v7x) + VMEM capacity."""
    kind = ""
    try:
        kind = jax.devices()[0].device_kind.lower()
    except Exception:
        pass
    wide_mxu = ("v6" in kind) or ("v7" in kind)      # 2x256^2 MXU generations
    is_v5 = "v5" in kind                             # ~820 GB/s HBM, 4x128^2 MXU
    try:
        vmem_cap = int(pltpu.get_tpu_info().vmem_capacity_bytes)
    except Exception:
        vmem_cap = 64 * 2**20                        # v7x lower bound
    return wide_mxu, is_v5, vmem_cap


def _k_tiling(K):
    """Returns (K_pad, tile_k). Single reduction block when it fits."""
    K_pad = _round_up(K, 128)
    if K_pad <= _MAX_SINGLE_K:
        return K_pad, K_pad
    for tk in (512, 256, 128):                       # keep MXU-friendly widths
        if K_pad % tk == 0:
            return K_pad, tk
    return K_pad, 128


# ----------------------------- kernels --------------------------------------

def _conv_bn_relu_kernel_1k(p_ref, w_ref, sb_ref, o_ref):
    # Single K block: no accumulator scratch, direct lane-dense store.
    acc = jnp.dot(p_ref[...], w_ref[...], preferred_element_type=jnp.float32)
    y = acc * sb_ref[0:1, :] + sb_ref[1:2, :]
    o_ref[...] = jnp.maximum(y, 0.0).astype(o_ref.dtype)


def _conv_bn_relu_kernel(p_ref, w_ref, sb_ref, o_ref, acc_ref):
    # Multi K block: resident f32 accumulator, BN+ReLU fused into the epilogue.
    k = pl.program_id(2)

    @pl.when(k == 0)
    def _():
        acc_ref[...] = jnp.zeros_like(acc_ref)

    acc_ref[...] += jnp.dot(p_ref[...], w_ref[...],
                            preferred_element_type=jnp.float32)

    @pl.when(k == pl.num_programs(2) - 1)
    def _():
        y = acc_ref[...] * sb_ref[0:1, :] + sb_ref[1:2, :]
        o_ref[...] = jnp.maximum(y, 0.0).astype(o_ref.dtype)


# ----------------------------- wrapper ---------------------------------------

def _im2col(x, KH, KW, stride, padding, K_pad):
    """NCHW -> (N*OH*OW, K_pad) patch matrix, feature order (kh, kw, c).

    The K zero-padding is folded into the single concatenate that materializes
    the patch matrix (no separate pad/copy of the inflated array). For 1x1
    convs this is just a strided NCHW->NHWC relayout (no replication).
    """
    N, C, H, W = x.shape
    OH = (H + 2 * padding - KH) // stride + 1
    OW = (W + 2 * padding - KW) // stride + 1
    if padding:
        x = jnp.pad(x, ((0, 0), (0, 0), (padding, padding), (padding, padding)))
    pieces = []
    for kh in range(KH):
        for kw in range(KW):
            pieces.append(
                x[:, :, kh:kh + stride * OH:stride, kw:kw + stride * OW:stride]
                .transpose(0, 2, 3, 1))               # (N, OH, OW, C)
    K = KH * KW * C
    if K_pad != K:
        pieces.append(jnp.zeros((N, OH, OW, K_pad - K), x.dtype))
    p = jnp.concatenate(pieces, axis=-1) if len(pieces) > 1 else pieces[0]
    return p.reshape(N * OH * OW, K_pad), OH, OW


def pack_basic_conv2d_params(weight, gamma, beta, running_mean, running_var,
                             *, eps=1e-3):
    """One-time (inference) prepack: bf16 (K_pad, OC_pad) weight matrix in
    (kh, kw, c) feature order + eval-mode BN folded into one (2, OC_pad) f32
    scale/bias slab."""
    OC, C, KH, KW = weight.shape
    wide_mxu, _, _ = _tpu_defaults()
    n_align = 256 if (wide_mxu and _round_up(OC, 128) >= 256) else 128
    OC_pad = _round_up(OC, n_align)
    K = KH * KW * C
    K_pad, _ = _k_tiling(K)

    w_mat = (weight.astype(jnp.bfloat16)
             .transpose(2, 3, 1, 0).reshape(K, OC))      # (K, OC)
    w_mat = jnp.pad(w_mat, ((0, K_pad - K), (0, OC_pad - OC)))

    scale = (gamma / jnp.sqrt(running_var + eps)).astype(jnp.float32)
    bias = beta.astype(jnp.float32) - running_mean.astype(jnp.float32) * scale
    sb = jnp.stack([jnp.pad(scale, (0, OC_pad - OC)),
                    jnp.pad(bias, (0, OC_pad - OC))], axis=0)   # (2, OC_pad)

    meta = (OC, C, KH, KW, OC_pad)
    return w_mat, sb, meta


def basic_conv2d_packed(x, w_mat, sb, meta, *, stride, padding,
                        out_dtype=None, tile_m=1024):
    OC, C, KH, KW, OC_pad = meta
    N, Cx, H, W = x.shape
    assert Cx == C, (Cx, C)
    out_dtype = out_dtype or x.dtype   # pass jnp.bfloat16 to halve writeback

    K = KH * KW * C
    K_pad, tile_k = _k_tiling(K)
    single_k = (tile_k == K_pad)

    # im2col in bf16 (halves the materialized patch-matrix HBM traffic),
    # produced directly at its padded K width.
    patches, OH, OW = _im2col(x.astype(jnp.bfloat16), KH, KW, stride, padding,
                              K_pad)
    M = patches.shape[0]

    wide_mxu, is_v5, vmem_cap = _tpu_defaults()

    # N tiling: lane-dense; 256-wide for v6e/v7x; collapse j when the weight
    # slab is small so the patch matrix is streamed from HBM exactly once
    # (its index_map ignores j).
    tile_n = OC_pad if OC_pad <= 512 else (256 if wide_mxu else 128)

    # M tiling: multiple of 16 (bf16 sublane packing), large to amortize the
    # ~0.35us/step overhead; keep >= 2 parallel tiles so both v7x TensorCores
    # get work even for small layers. Partial last M block is masked by Pallas.
    tile_m = min(tile_m, _round_up(M, 16))
    if pl.cdiv(M, tile_m) * (OC_pad // tile_n) < 2 and M >= 32:
        tile_m = _round_up(pl.cdiv(M, 2), 16)
    grid_m = pl.cdiv(M, tile_m)

    # v5e: the im2col-inflated LHS stream is the exposed DMA -> 3-deep buffers.
    lhs_kw = dict(pipeline_mode=pl.Buffered(3)) if is_v5 else {}
    lhs_bufs = 3 if is_v5 else 2

    out_bytes = jnp.dtype(out_dtype).itemsize
    if single_k:
        grid = (grid_m, OC_pad // tile_n)
        in_specs = [
            pl.BlockSpec((tile_m, K_pad), lambda i, j: (i, 0), **lhs_kw),
            pl.BlockSpec((K_pad, tile_n), lambda i, j: (0, j)),
            pl.BlockSpec((2, tile_n), lambda i, j: (0, j)),
        ]
        out_specs = pl.BlockSpec((tile_m, tile_n), lambda i, j: (i, j))
        scratch_shapes = []
        kernel = _conv_bn_relu_kernel_1k
        dims = ("parallel", "parallel")
        vmem_est = (lhs_bufs * tile_m * K_pad * 2 + 2 * K_pad * tile_n * 2
                    + 2 * 2 * tile_n * 4 + 2 * tile_m * tile_n * out_bytes)
    else:
        grid = (grid_m, OC_pad // tile_n, K_pad // tile_k)
        in_specs = [
            pl.BlockSpec((tile_m, tile_k), lambda i, j, k: (i, k), **lhs_kw),
            pl.BlockSpec((tile_k, tile_n), lambda i, j, k: (k, j)),
            pl.BlockSpec((2, tile_n), lambda i, j, k: (0, j)),
        ]
        out_specs = pl.BlockSpec((tile_m, tile_n), lambda i, j, k: (i, j))
        scratch_shapes = [pltpu.VMEM((tile_m, tile_n), jnp.float32)]
        kernel = _conv_bn_relu_kernel
        dims = ("parallel", "parallel", "arbitrary")
        vmem_est = (lhs_bufs * tile_m * tile_k * 2 + 2 * tile_k * tile_n * 2
                    + 2 * 2 * tile_n * 4 + 2 * tile_m * tile_n * out_bytes
                    + tile_m * tile_n * 4)

    # 1.5x headroom on the estimate, capped at 3/4 of this generation's VMEM
    # (i.e. <= 48 MiB on v7x's 64 MiB/TC), floored at 32 MiB for safety.
    vmem_limit = int(min(3 * vmem_cap // 4,
                         max(32 * 2**20, int(1.5 * vmem_est))))

    out = pl.pallas_call(
        kernel,
        out_shape=jax.ShapeDtypeStruct((M, OC_pad), out_dtype),
        grid_spec=pltpu.PrefetchScalarGridSpec(
            num_scalar_prefetch=0,
            grid=grid,
            in_specs=in_specs,
            out_specs=out_specs,
            scratch_shapes=scratch_shapes),
        compiler_params=pltpu.CompilerParams(
            dimension_semantics=dims,
            vmem_limit_bytes=vmem_limit),
    )(patches, w_mat, sb)

    out = out[:, :OC]                                   # drop OC padding
    # back to NCHW (PyTorch module semantics)
    return out.reshape(N, OH, OW, OC).transpose(0, 3, 1, 2)


def basic_conv2d(x, weight, gamma, beta, running_mean, running_var,
                 *, stride, padding, eps=1e-3, out_dtype=None, tile_m=1024):
    """Convenience one-shot API (packs params per call)."""
    w_mat, sb, meta = pack_basic_conv2d_params(
        weight, gamma, beta, running_mean, running_var, eps=eps)
    return basic_conv2d_packed(x, w_mat, sb, meta, stride=stride,
                               padding=padding, out_dtype=out_dtype,
                               tile_m=tile_m)


def _reference(x, weight, gamma, beta, running_mean, running_var,
               *, stride, padding, eps=1e-3):
    y = jax.lax.conv_general_dilated(
        x, weight, window_strides=(stride, stride),
        padding=[(padding, padding), (padding, padding)],
        dimension_numbers=("NCHW", "OIHW", "NCHW"))
    scale = (gamma / jnp.sqrt(running_var + eps)).reshape(1, -1, 1, 1)
    bias = (beta - running_mean * gamma / jnp.sqrt(running_var + eps)
            ).reshape(1, -1, 1, 1)
    return jnp.maximum(y * scale + bias, 0.0)


if __name__ == "__main__":
    # BasicConv2d(in_planes=4, out_planes=8, kernel_size=3, stride=1, padding=1)
    N, C, H, W = 2, 4, 16, 16
    OC, KS, STRIDE, PAD = 8, 3, 1, 1

    key = jax.random.PRNGKey(0)
    k_x, k_w, k_g, k_b, k_m, k_v = jax.random.split(key, 6)

    x = jax.random.normal(k_x, (N, C, H, W), dtype=jnp.float32)
    weight = jax.random.normal(k_w, (OC, C, KS, KS), dtype=jnp.float32) * 0.1
    gamma = jax.random.normal(k_g, (OC,), dtype=jnp.float32) * 0.1 + 1.0
    beta = jax.random.normal(k_b, (OC,), dtype=jnp.float32) * 0.1
    running_mean = jax.random.normal(k_m, (OC,), dtype=jnp.float32) * 0.1
    running_var = jax.random.uniform(k_v, (OC,), dtype=jnp.float32,
                                     minval=0.5, maxval=1.5)

    # Prepack inference constants once; jit the packed forward.
    w_mat, sb, meta = pack_basic_conv2d_params(
        weight, gamma, beta, running_mean, running_var)
    conv_fn = jax.jit(functools.partial(basic_conv2d_packed, meta=meta,
                                        stride=STRIDE, padding=PAD))

    out = conv_fn(x, w_mat, sb)
    out = jax.block_until_ready(out)

    ref = _reference(x, weight, gamma, beta, running_mean, running_var,
                     stride=STRIDE, padding=PAD)
    assert out.shape == (N, OC, H, W), out.shape
    # bf16 MXU inputs with f32 accumulation -> loosen tolerance vs f32 reference.
    assert jnp.allclose(out, ref, atol=3e-2, rtol=3e-2), \
        float(jnp.max(jnp.abs(out - ref)))

    print("KERNEL_OK")
</pallas_src>

<mosaic_0001>
module attributes {stable_mosaic.version = 11 : i64} {
  func.func @_conv_bn_relu_kernel_1k(%arg0: i32, %arg1: i32, %arg2: memref<256x128xbf16, #tpu.memory_space<vmem>>, %arg3: memref<128x128xbf16, #tpu.memory_space<vmem>>, %arg4: memref<2x128xf32, #tpu.memory_space<vmem>>, %arg5: memref<256x128xf32, #tpu.memory_space<vmem>>) attributes {dimension_semantics = [#tpu.dimension_semantics<parallel>, #tpu.dimension_semantics<parallel>], iteration_bounds = array<i64: 2, 1>, scalar_prefetch = 0 : i64, scratch_operands = 0 : i64, tpu.core_type = #tpu.core_type<tc>, window_params = [{transform_indices = @transform_0, window_bounds = array<i64: 256, 128>}, {transform_indices = @transform_1, window_bounds = array<i64: 128, 128>}, {transform_indices = @transform_2, window_bounds = array<i64: 2, 128>}, {transform_indices = @transform_3, window_bounds = array<i64: 256, 128>}]} {
    %c0 = arith.constant 0 : index
    %c0_0 = arith.constant 0 : index
    %0 = vector.load %arg2[%c0, %c0_0] : memref<256x128xbf16, #tpu.memory_space<vmem>>, vector<256x128xbf16>
    %c0_1 = arith.constant 0 : index
    %c0_2 = arith.constant 0 : index
    %1 = vector.load %arg3[%c0_1, %c0_2] : memref<128x128xbf16, #tpu.memory_space<vmem>>, vector<128x128xbf16>
    %cst = arith.constant dense<0.000000e+00> : vector<256x128xf32>
    %2 = tpu.matmul %0, %1, %cst {dimension_numbers = #tpu.dot_dimension_numbers<[1], [0], [0], [1], [0, 0, 1, 1], [], []>} : vector<256x128xbf16>, vector<128x128xbf16>, vector<256x128xf32> -> vector<256x128xf32>
    %c0_3 = arith.constant 0 : index
    %c0_4 = arith.constant 0 : index
    %3 = vector.load %arg4[%c0_3, %c0_4] : memref<2x128xf32, #tpu.memory_space<vmem>>, vector<1x128xf32>
    %4 = vector.broadcast %3 : vector<1x128xf32> to vector<256x128xf32>
    %5 = arith.mulf %2, %4 : vector<256x128xf32>
    %c1 = arith.constant 1 : index
    %c0_5 = arith.constant 0 : index
    %6 = vector.load %arg4[%c1, %c0_5] : memref<2x128xf32, #tpu.memory_space<vmem>>, vector<1x128xf32>
    %7 = vector.broadcast %6 : vector<1x128xf32> to vector<256x128xf32>
    %8 = arith.addf %5, %7 : vector<256x128xf32>
    %cst_6 = arith.constant 0.000000e+00 : f32
    %9 = vector.broadcast %cst_6 : f32 to vector<256x128xf32>
    %10 = arith.maximumf %8, %9 : vector<256x128xf32>
    %c0_7 = arith.constant 0 : index
    %c0_8 = arith.constant 0 : index
    %11 = vector.load %arg5[%c0_7, %c0_8] : memref<256x128xf32, #tpu.memory_space<vmem>>, vector<256x128xf32>
    tpu.vector_store %arg5[%c0_7, %c0_8], %10 {strides = array<i32>} : memref<256x128xf32, #tpu.memory_space<vmem>>, vector<256x128xf32>,
    return
  }
  func.func @transform_0(%arg0: i32, %arg1: i32) -> (i32, i32) {
    %c0_i32 = arith.constant 0 : i32
    %c0_i32_0 = arith.constant 0 : i32
    return %arg0, %c0_i32 : i32, i32
  }
  func.func @transform_1(%arg0: i32, %arg1: i32) -> (i32, i32) {
    %c0_i32 = arith.constant 0 : i32
    %c0_i32_0 = arith.constant 0 : i32
    return %c0_i32, %arg1 : i32, i32
  }
  func.func @transform_2(%arg0: i32, %arg1: i32) -> (i32, i32) {
    %c0_i32 = arith.constant 0 : i32
    %c0_i32_0 = arith.constant 0 : i32
    return %c0_i32, %arg1 : i32, i32
  }
  func.func @transform_3(%arg0: i32, %arg1: i32) -> (i32, i32) {
    %c0_i32 = arith.constant 0 : i32
    return %arg0, %arg1 : i32, i32
  }
}

</mosaic_0001>

<bundles_post_ra>
// kernel: basic_conv2d_packed.1
= control target key start
LH: loop header
LB: loop body
LE: loop exit
PB: predicated region body
PF: predicated region fallthrough
CT: control target
= control target key end

     0   :  { %s973_s12 = smov 0   ;;  %s975_s13 = smov 0   ;;  %s1163_s0 = inlined_call_operand.vmem [shape: bf16[512,128], index: 0, kind: input, shape index: {}]   ;;  %s1164_s1 = inlined_call_operand.vmem [shape: bf16[128,128], index: 1, kind: input, shape index: {}]   ;;  %s1165_s2 = inlined_call_operand.vmem [shape: f32[2,128], index: 2, kind: input, shape index: {}]   ;;  %s1166_s3 = inlined_call_operand.vmem [shape: f32[512,128], index: 3, kind: output, shape index: {}]  }
   0x1   :  { %s977_s14 = smov 0  }
   0x2 LB: > { %s25_s15 = sadd.s32 1, %s947_s13  ;;  %p752_p0 = scmp.ge.s32.totalorder %s951_s14, 1  ;;  %s951_s14 = sphi %s977_s14, %s13_s14   ;;  %s947_s13 = sphi %s975_s13, %s1168_s13   ;;  %s943_s12 = sphi %s973_s12, %s1167_s12  }
   0x3   : > { %p27_p1 = scmp.ge.s32.totalorder %s25_s15, 2  ;;  %p170_p2 = scmp.lt.s32.totalorder %s951_s14, 3 }
   0x5   : > { %s1170_s15 = smov (%p27_p1, %s25_s15), 0  ;;  %p171_p3 = pnand %p752_p0, %p170_p2 }
   0x6   : > { %s753_s24 = sshll.u32 (!%p171_p3), %s943_s12, 5 }
   0x7   : > { %174 = sbr.rel (%p171_p3) target bundleno = 241 (0xf1), region = 32  ;;  %p206_p4 = scmp.lt.s32.totalorder (!%p171_p3), %s753_s24, 63 }
   0xc   : > { %v878_v0 = vld [vmem:[%s1164_s1 + $0x38] sm:$0xff]  ;;  %v877_v1 = vld [vmem:[%s1164_s1 + $0x30] sm:$0xff]  ;;  %v876_v2 = vld [vmem:[%s1164_s1 + $0x28] sm:$0xff]  ;;  %s1172_s24 = smov (!%p206_p4, %s753_s24), 63 }
   0xd   : > { %420 = vmatpush.bf16.msra.mxu0 %v878_v0  ;;  %879 = vmatpush.bf16.msra.mxu1 %v878_v0  ;;  %v875_v3 = vld [vmem:[%s1164_s1 + $0x20] sm:$0xff]  ;;  %v874_v4 = vld [vmem:[%s1164_s1 + $0x18] sm:$0xff]  ;;  %v873_v5 = vld [vmem:[%s1164_s1 + $0x10] sm:$0xff]  ;;  %s754_s4 = sshll.u32 %s1172_s24, 2  ;;  %s756_s17 = sshll.u32 %s1172_s24, 3 }
   0xe   : > { %880 = vmatpush.bf16.msra.mxu2 %v878_v0  ;;  %881 = vmatpush.bf16.msra.mxu3 %v878_v0  ;;  %v872_v6 = vld [vmem:[%s1164_s1 + $0x8] sm:$0xff]  ;;  %v871_v7 = vld [vmem:[%s1164_s1] sm:$0xff]  ;;  %s1024_s9 = scalar_lea.vmem %s1163_s0, %s754_s4  ;;  %s1060_s20 = scalar_lea.vmem %s1166_s3, %s756_s17 }
   0xf   : > { %v855_v8 = vld [vmem:[%s1024_s9] sm:$0xff]  ;;  %v856_v12 = vld [vmem:[%s1024_s9 + $0x8] sm:$0xff]  ;;  %v857_v16 = vld [vmem:[%s1024_s9 + $0x10] sm:$0xff] }
  0x10   : > { %v859_v9 = vld [vmem:[%s1024_s9 + $0x20] sm:$0xff]  ;;  %v860_v13 = vld [vmem:[%s1024_s9 + $0x28] sm:$0xff]  ;;  %v861_v17 = vld [vmem:[%s1024_s9 + $0x30] sm:$0xff] }
  0x11   : > { %421 = vmatpush.bf16.msra.mxu0 %v877_v1  ;;  %882 = vmatpush.bf16.msra.mxu1 %v877_v1  ;;  %v863_v10 = vld [vmem:[%s1024_s9 + $0x40] sm:$0xff]  ;;  %v864_v14 = vld [vmem:[%s1024_s9 + $0x48] sm:$0xff]  ;;  %v865_v18 = vld [vmem:[%s1024_s9 + $0x50] sm:$0xff] }
  0x12   : > { %883 = vmatpush.bf16.msra.mxu2 %v877_v1  ;;  %884 = vmatpush.bf16.msra.mxu3 %v877_v1  ;;  %v867_v11 = vld [vmem:[%s1024_s9 + $0x60] sm:$0xff]  ;;  %v868_v15 = vld [vmem:[%s1024_s9 + $0x68] sm:$0xff]  ;;  %v869_v19 = vld [vmem:[%s1024_s9 + $0x70] sm:$0xff] }
  0x13   : > { %v858_v20 = vld [vmem:[%s1024_s9 + $0x18] sm:$0xff]  ;;  %v1045_v24 = vld [vmem:[%s1165_s2] ss:$0 sm:$0xff]  ;;  %v1050_v25 = vld [vmem:[%s1165_s2 + $0x1] ss:$0 sm:$0xff] }
  0x14   : > { %v862_v21 = vld [vmem:[%s1024_s9 + $0x38] sm:$0xff] }
  0x15   : > { %422 = vmatpush.bf16.msra.mxu0 %v876_v2  ;;  %885 = vmatpush.bf16.msra.mxu1 %v876_v2  ;;  %v866_v22 = vld [vmem:[%s1024_s9 + $0x58] sm:$0xff] }
  0x16   : > { %886 = vmatpush.bf16.msra.mxu2 %v876_v2  ;;  %887 = vmatpush.bf16.msra.mxu3 %v876_v2  ;;  %v870_v23 = vld [vmem:[%s1024_s9 + $0x78] sm:$0xff] }
  0x19   : > { %423 = vmatpush.bf16.msra.mxu0 %v875_v3  ;;  %888 = vmatpush.bf16.msra.mxu1 %v875_v3 }
  0x1a   : > { %889 = vmatpush.bf16.msra.mxu2 %v875_v3  ;;  %890 = vmatpush.bf16.msra.mxu3 %v875_v3 }
  0x1d   : > { %424 = vmatpush.bf16.msra.mxu0 %v874_v4  ;;  %891 = vmatpush.bf16.msra.mxu1 %v874_v4 }
  0x1e   : > { %892 = vmatpush.bf16.msra.mxu2 %v874_v4  ;;  %893 = vmatpush.bf16.msra.mxu3 %v874_v4 }
  0x21   : > { %425 = vmatpush.bf16.msra.mxu0 %v873_v5  ;;  %894 = vmatpush.bf16.msra.mxu1 %v873_v5 }
  0x22   : > { %895 = vmatpush.bf16.msra.mxu2 %v873_v5  ;;  %896 = vmatpush.bf16.msra.mxu3 %v873_v5 }
  0x25   : > { %426 = vmatpush.bf16.msra.mxu0 %v872_v6  ;;  %897 = vmatpush.bf16.msra.mxu1 %v872_v6 }
  0x26   : > { %898 = vmatpush.bf16.msra.mxu2 %v872_v6  ;;  %899 = vmatpush.bf16.msra.mxu3 %v872_v6 }
  0x29   : > { %427 = vmatpush.bf16.msra.mxu0 %v871_v7  ;;  %900 = vmatpush.bf16.msra.mxu1 %v871_v7 }
  0x2a   : > { %901 = vmatpush.bf16.msra.mxu2 %v871_v7  ;;  %902 = vmatpush.bf16.msra.mxu3 %v871_v7 }
  0x2c   : > { %428 = vmatmul.bf16.vlgmr.msra.gmra.mxu0 %v855_v8  ;;  %448 = vmatmul.bf16.vlgmr.msra.gmra.mxu1 %v859_v9 }
  0x2d   : > { %468 = vmatmul.bf16.vlgmr.msra.gmra.mxu2 %v863_v10  ;;  %488 = vmatmul.bf16.vlgmr.msra.gmra.mxu3 %v867_v11 }
  0x3c   : > { %433 = vmatmul.bf16.gmra.mxu0 %v856_v12  ;;  %453 = vmatmul.bf16.gmra.mxu1 %v860_v13 }
  0x3d   : > { %473 = vmatmul.bf16.gmra.mxu2 %v864_v14  ;;  %493 = vmatmul.bf16.gmra.mxu3 %v868_v15 }
  0x4c   : > { %438 = vmatmul.bf16.gmra.mxu0 %v857_v16  ;;  %458 = vmatmul.bf16.gmra.mxu1 %v861_v17 }
  0x4d   : > { %478 = vmatmul.bf16.gmra.mxu2 %v865_v18  ;;  %498 = vmatmul.bf16.gmra.mxu3 %v869_v19 }
  0x5c   : > { %443 = vmatmul.bf16.gmra.mxu0 %v858_v20  ;;  %463 = vmatmul.bf16.gmra.mxu1 %v862_v21 }
  0x5d   : > { %483 = vmatmul.bf16.gmra.mxu2 %v866_v22  ;;  %503 = vmatmul.bf16.gmra.mxu3 %v870_v23 }
  0xa9   : > { %v429_v26 = vpop.f32.mrf.mxu0  ;;  %v449_v27 = vpop.f32.mrf.mxu1 }
  0xaa   : > { %v511_v28 = vmul.f32 %v1045_v24, %v429_v26  ;;  %v519_v29 = vmul.f32 %v1045_v24, %v449_v27 }
  0xac   : > { %v545_v30 = vadd.f32 %v1050_v25, %v511_v28  ;;  %v553_v31 = vadd.f32 %v1050_v25, %v519_v29 }
  0xae   : > { %v577_v32 = vmax.f32 %v545_v30, 0.0  ;;  %v585_v33 = vmax.f32 %v553_v31, 0.0 }
  0xb0   : > { %609 = vst [vmem:[%s1060_s20] sm:$0xff] %v577_v32  ;;  %v469_v34 = vpop.f32.mrf.mxu2  ;;  %v489_v35 = vpop.f32.mrf.mxu3 }
  0xb1   : > { %617 = vst [vmem:[%s1060_s20 + $0x40] sm:$0xff] %v585_v33  ;;  %v527_v36 = vmul.f32 %v1045_v24, %v469_v34  ;;  %v535_v37 = vmul.f32 %v1045_v24, %v489_v35  ;;  %v431_v38 = vpop.f32.mrf.mxu0  ;;  %v451_v39 = vpop.f32.mrf.mxu1 }
  0xb2   : > { %v512_v40 = vmul.f32 %v1045_v24, %v431_v38  ;;  %v520_v41 = vmul.f32 %v1045_v24, %v451_v39 }
  0xb3   : > { %v561_v42 = vadd.f32 %v1050_v25, %v527_v36  ;;  %v569_v43 = vadd.f32 %v1050_v25, %v535_v37 }
  0xb4   : > { %v546_v44 = vadd.f32 %v1050_v25, %v512_v40  ;;  %v554_v45 = vadd.f32 %v1050_v25, %v520_v41 }
  0xb5   : > { %v593_v46 = vmax.f32 %v561_v42, 0.0  ;;  %v601_v47 = vmax.f32 %v569_v43, 0.0 }
  0xb6   : > { %v578_v48 = vmax.f32 %v546_v44, 0.0  ;;  %v586_v49 = vmax.f32 %v554_v45, 0.0 }
  0xb7   : > { %625 = vst [vmem:[%s1060_s20 + $0x80] sm:$0xff] %v593_v46 }
  0xb8   : > { %633 = vst [vmem:[%s1060_s20 + $0xc0] sm:$0xff] %v601_v47  ;;  %v471_v50 = vpop.f32.mrf.mxu2  ;;  %v491_v51 = vpop.f32.mrf.mxu3 }
  0xb9   : > { %610 = vst [vmem:[%s1060_s20 + $0x8] sm:$0xff] %v578_v48  ;;  %v528_v52 = vmul.f32 %v1045_v24, %v471_v50  ;;  %v536_v53 = vmul.f32 %v1045_v24, %v491_v51  ;;  %v434_v54 = vpop.f32.mrf.mxu0  ;;  %v454_v55 = vpop.f32.mrf.mxu1 }
  0xba   : > { %618 = vst [vmem:[%s1060_s20 + $0x48] sm:$0xff] %v586_v49  ;;  %v513_v56 = vmul.f32 %v1045_v24, %v434_v54  ;;  %v521_v57 = vmul.f32 %v1045_v24, %v454_v55 }
  0xbb   : > { %v562_v58 = vadd.f32 %v1050_v25, %v528_v52  ;;  %v570_v59 = vadd.f32 %v1050_v25, %v536_v53 }
  0xbc   : > { %v547_v60 = vadd.f32 %v1050_v25, %v513_v56  ;;  %v555_v61 = vadd.f32 %v1050_v25, %v521_v57 }
  0xbd   : > { %v594_v62 = vmax.f32 %v562_v58, 0.0  ;;  %v602_v63 = vmax.f32 %v570_v59, 0.0 }
  0xbe   : > { %v579_v0 = vmax.f32 %v547_v60, 0.0  ;;  %v587_v1 = vmax.f32 %v555_v61, 0.0 }
  0xbf   : > { %626 = vst [vmem:[%s1060_s20 + $0x88] sm:$0xff] %v594_v62 }
  0xc0   : > { %634 = vst [vmem:[%s1060_s20 + $0xc8] sm:$0xff] %v602_v63  ;;  %v474_v2 = vpop.f32.mrf.mxu2  ;;  %v494_v3 = vpop.f32.mrf.mxu3 }
  0xc1   : > { %611 = vst [vmem:[%s1060_s20 + $0x10] sm:$0xff] %v579_v0  ;;  %v529_v4 = vmul.f32 %v1045_v24, %v474_v2  ;;  %v537_v5 = vmul.f32 %v1045_v24, %v494_v3  ;;  %v436_v6 = vpop.f32.mrf.mxu0  ;;  %v456_v7 = vpop.f32.mrf.mxu1 }
  0xc2   : > { %619 = vst [vmem:[%s1060_s20 + $0x50] sm:$0xff] %v587_v1  ;;  %v514_v8 = vmul.f32 %v1045_v24, %v436_v6  ;;  %v522_v9 = vmul.f32 %v1045_v24, %v456_v7 }
  0xc3   : > { %v563_v10 = vadd.f32 %v1050_v25, %v529_v4  ;;  %v571_v11 = vadd.f32 %v1050_v25, %v537_v5 }
  0xc4   : > { %v548_v12 = vadd.f32 %v1050_v25, %v514_v8  ;;  %v556_v13 = vadd.f32 %v1050_v25, %v522_v9 }
  0xc5   : > { %v595_v14 = vmax.f32 %v563_v10, 0.0  ;;  %v603_v15 = vmax.f32 %v571_v11, 0.0 }
  0xc6   : > { %v580_v16 = vmax.f32 %v548_v12, 0.0  ;;  %v588_v17 = vmax.f32 %v556_v13, 0.0 }
  0xc7   : > { %627 = vst [vmem:[%s1060_s20 + $0x90] sm:$0xff] %v595_v14 }
  0xc8   : > { %635 = vst [vmem:[%s1060_s20 + $0xd0] sm:$0xff] %v603_v15  ;;  %v476_v18 = vpop.f32.mrf.mxu2  ;;  %v496_v19 = vpop.f32.mrf.mxu3 }
  0xc9   : > { %612 = vst [vmem:[%s1060_s20 + $0x18] sm:$0xff] %v580_v16  ;;  %v530_v20 = vmul.f32 %v1045_v24, %v476_v18  ;;  %v538_v21 = vmul.f32 %v1045_v24, %v496_v19  ;;  %v439_v22 = vpop.f32.mrf.mxu0  ;;  %v459_v23 = vpop.f32.mrf.mxu1 }
  0xca   : > { %620 = vst [vmem:[%s1060_s20 + $0x58] sm:$0xff] %v588_v17  ;;  %v515_v26 = vmul.f32 %v1045_v24, %v439_v22  ;;  %v523_v27 = vmul.f32 %v1045_v24, %v459_v23 }
  0xcb   : > { %v564_v28 = vadd.f32 %v1050_v25, %v530_v20  ;;  %v572_v29 = vadd.f32 %v1050_v25, %v538_v21 }
  0xcc   : > { %v549_v30 = vadd.f32 %v1050_v25, %v515_v26  ;;  %v557_v31 = vadd.f32 %v1050_v25, %v523_v27 }
  0xcd   : > { %v596_v32 = vmax.f32 %v564_v28, 0.0  ;;  %v604_v33 = vmax.f32 %v572_v29, 0.0 }
  0xce   : > { %v581_v34 = vmax.f32 %v549_v30, 0.0  ;;  %v589_v35 = vmax.f32 %v557_v31, 0.0 }
  0xcf   : > { %628 = vst [vmem:[%s1060_s20 + $0x98] sm:$0xff] %v596_v32 }
  0xd0   : > { %636 = vst [vmem:[%s1060_s20 + $0xd8] sm:$0xff] %v604_v33  ;;  %v479_v36 = vpop.f32.mrf.mxu2  ;;  %v499_v37 = vpop.f32.mrf.mxu3 }
  0xd1   : > { %613 = vst [vmem:[%s1060_s20 + $0x20] sm:$0xff] %v581_v34  ;;  %v531_v38 = vmul.f32 %v1045_v24, %v479_v36  ;;  %v539_v39 = vmul.f32 %v1045_v24, %v499_v37  ;;  %v441_v40 = vpop.f32.mrf.mxu0  ;;  %v461_v41 = vpop.f32.mrf.mxu1 }
  0xd2   : > { %621 = vst [vmem:[%s1060_s20 + $0x60] sm:$0xff] %v589_v35  ;;  %v516_v42 = vmul.f32 %v1045_v24, %v441_v40  ;;  %v524_v43 = vmul.f32 %v1045_v24, %v461_v41 }
  0xd3   : > { %v565_v44 = vadd.f32 %v1050_v25, %v531_v38  ;;  %v573_v45 = vadd.f32 %v1050_v25, %v539_v39 }
  0xd4   : > { %v550_v46 = vadd.f32 %v1050_v25, %v516_v42  ;;  %v558_v47 = vadd.f32 %v1050_v25, %v524_v43 }
  0xd5   : > { %v597_v48 = vmax.f32 %v565_v44, 0.0  ;;  %v605_v49 = vmax.f32 %v573_v45, 0.0 }
  0xd6   : > { %v582_v50 = vmax.f32 %v550_v46, 0.0  ;;  %v590_v51 = vmax.f32 %v558_v47, 0.0 }
  0xd7   : > { %629 = vst [vmem:[%s1060_s20 + $0xa0] sm:$0xff] %v597_v48 }
  0xd8   : > { %637 = vst [vmem:[%s1060_s20 + $0xe0] sm:$0xff] %v605_v49  ;;  %v481_v52 = vpop.f32.mrf.mxu2  ;;  %v501_v53 = vpop.f32.mrf.mxu3 }
  0xd9   : > { %614 = vst [vmem:[%s1060_s20 + $0x28] sm:$0xff] %v582_v50  ;;  %v532_v54 = vmul.f32 %v1045_v24, %v481_v52  ;;  %v540_v55 = vmul.f32 %v1045_v24, %v501_v53  ;;  %v444_v56 = vpop.f32.mrf.mxu0  ;;  %v464_v57 = vpop.f32.mrf.mxu1 }
  0xda   : > { %622 = vst [vmem:[%s1060_s20 + $0x68] sm:$0xff] %v590_v51  ;;  %v517_v58 = vmul.f32 %v1045_v24, %v444_v56  ;;  %v525_v59 = vmul.f32 %v1045_v24, %v464_v57 }
  0xdb   : > { %v566_v60 = vadd.f32 %v1050_v25, %v532_v54  ;;  %v574_v61 = vadd.f32 %v1050_v25, %v540_v55 }
  0xdc   : > { %v551_v62 = vadd.f32 %v1050_v25, %v517_v58  ;;  %v559_v63 = vadd.f32 %v1050_v25, %v525_v59 }
  0xdd   : > { %v598_v0 = vmax.f32 %v566_v60, 0.0  ;;  %v606_v1 = vmax.f32 %v574_v61, 0.0 }
  0xde   : > { %v583_v2 = vmax.f32 %v551_v62, 0.0  ;;  %v591_v3 = vmax.f32 %v559_v63, 0.0 }
  0xdf   : > { %630 = vst [vmem:[%s1060_s20 + $0xa8] sm:$0xff] %v598_v0 }
  0xe0   : > { %638 = vst [vmem:[%s1060_s20 + $0xe8] sm:$0xff] %v606_v1  ;;  %v484_v4 = vpop.f32.mrf.mxu2  ;;  %v504_v5 = vpop.f32.mrf.mxu3 }
  0xe1   : > { %615 = vst [vmem:[%s1060_s20 + $0x30] sm:$0xff] %v583_v2  ;;  %v533_v6 = vmul.f32 %v1045_v24, %v484_v4  ;;  %v541_v7 = vmul.f32 %v1045_v24, %v504_v5  ;;  %v446_v8 = vpop.f32.mrf.mxu0  ;;  %v466_v9 = vpop.f32.mrf.mxu1 }
  0xe2   : > { %623 = vst [vmem:[%s1060_s20 + $0x70] sm:$0xff] %v591_v3  ;;  %v518_v10 = vmul.f32 %v1045_v24, %v446_v8  ;;  %v526_v11 = vmul.f32 %v1045_v24, %v466_v9 }
  0xe3   : > { %v567_v12 = vadd.f32 %v1050_v25, %v533_v6  ;;  %v575_v13 = vadd.f32 %v1050_v25, %v541_v7 }
  0xe4   : > { %v552_v14 = vadd.f32 %v1050_v25, %v518_v10  ;;  %v560_v15 = vadd.f32 %v1050_v25, %v526_v11 }
  0xe5   : > { %v599_v16 = vmax.f32 %v567_v12, 0.0  ;;  %v607_v17 = vmax.f32 %v575_v13, 0.0 }
  0xe6   : > { %v584_v18 = vmax.f32 %v552_v14, 0.0  ;;  %v592_v19 = vmax.f32 %v560_v15, 0.0 }
  0xe7   : > { %631 = vst [vmem:[%s1060_s20 + $0xb0] sm:$0xff] %v599_v16 }
  0xe8   : > { %639 = vst [vmem:[%s1060_s20 + $0xf0] sm:$0xff] %v607_v17  ;;  %v486_v20 = vpop.f32.mrf.mxu2  ;;  %v506_v21 = vpop.f32.mrf.mxu3 }
  0xe9   : > { %616 = vst [vmem:[%s1060_s20 + $0x38] sm:$0xff] %v584_v18  ;;  %v534_v22 = vmul.f32 %v1045_v24, %v486_v20  ;;  %v542_v23 = vmul.f32 %v1045_v24, %v506_v21 }
  0xea   : > { %624 = vst [vmem:[%s1060_s20 + $0x78] sm:$0xff] %v592_v19 }
  0xeb   : > { %v568_v26 = vadd.f32 %v1050_v25, %v534_v22  ;;  %v576_v27 = vadd.f32 %v1050_v25, %v542_v23 }
  0xed   : > { %v600_v28 = vmax.f32 %v568_v26, 0.0  ;;  %v608_v29 = vmax.f32 %v576_v27, 0.0 }
  0xef   : > { %632 = vst [vmem:[%s1060_s20 + $0xb8] sm:$0xff] %v600_v28 }
  0xf0   : > { %640 = vst [vmem:[%s1060_s20 + $0xf8] sm:$0xff] %v608_v29 }
  0xf1 PF: > { %s13_s14 = sadd.s32 1, %s951_s14   ;;  %s1167_s12 = smov %s947_s13 }
  0xf2   : > { %p10_p5 = scmp.ge.s32.totalorder %s13_s14, 4   ;;  %s1168_s13 = smov %s1170_s15 }
  0xf4   :  { %12 = sbr.rel (!%p10_p5) target bundleno = 2 (0x2), region = 68 }

</bundles_post_ra>
